<compile_context>
chip_gen: v5e
topology: v5e:2x2
jax: 0.10.0
libtpu: 0.0.40
codegen_flags: <defaults>
</compile_context>

<pallas_src>
import jax
import jax.numpy as jnp
from jax.experimental import pallas as pl
from jax.experimental.pallas import tpu as pltpu


LN_EPS = 1e-5  # PyTorch nn.LayerNorm default


def _round_up(n, m):
    return ((n + m - 1) // m) * m


def _vmem_capacity_bytes():
    """Physical VMEM per core (64 MiB on v7x, 128 MiB on v5e/v6e)."""
    try:
        return int(pltpu.get_tpu_info().vmem_capacity_bytes)
    except Exception:
        return 64 << 20  # conservative fallback (v7x-sized)


def _maybe_single_buffered_spec(shape, index_map, single_buffer):
    """BlockSpec; single-buffered when the block is grid-invariant."""
    if single_buffer:
        try:
            return pl.BlockSpec(shape, index_map, pipeline_mode=pl.Buffered(1))
        except Exception:
            pass  # older BlockSpec without pipeline_mode: fall back to default
    return pl.BlockSpec(shape, index_map)


def fold_layernorm_into_linear(gamma, beta, w, wb):
    """ONE-TIME parameter prep (do not call per forward pass).

    (xhat*gamma + beta) @ W + wb  ==  xhat @ (gamma[:,None]*W) + (beta @ W + wb)

    `w` is (D_in, D_out), i.e. the transpose of PyTorch nn.Linear's weight.
    Returns (w_folded bf16 (D, D), b_folded f32 (1, D)).
    """
    w_f32 = w.astype(jnp.float32)
    w_folded = (gamma.astype(jnp.float32)[:, None] * w_f32).astype(jnp.bfloat16)
    b_folded = (beta.astype(jnp.float32) @ w_f32
                + wb.astype(jnp.float32)).reshape(1, -1)
    return w_folded, b_folded


def prenorm_linear_kernel(x_ref, w_ref, b_ref, o_ref, xhat_ref):
    """Row tile: LayerNorm (f32 stats) -> bf16 xhat -> MXU matmul (f32 acc) + bias.

    Grid is (m_tiles, n_tiles).  LN runs once per row tile (j == 0); the bf16
    xhat is cached in VMEM scratch and reused against every W column panel.
    """
    @pl.when(pl.program_id(1) == 0)
    def _():
        x = x_ref[...].astype(jnp.float32)                                # (tile_m, D)
        mean = jnp.mean(x, axis=-1, keepdims=True)
        var = jnp.maximum(jnp.mean(x * x, axis=-1, keepdims=True) - mean * mean, 0.0)
        inv = jax.lax.rsqrt(var + LN_EPS)                                 # EUP
        xhat_ref[...] = ((x - mean) * inv).astype(jnp.bfloat16)

    out = jnp.dot(xhat_ref[...], w_ref[...], preferred_element_type=jnp.float32)
    o_ref[...] = (out + b_ref[...]).astype(o_ref.dtype)


def prenorm_linear(x, w_folded, b_folded, *, tile_m=None, tile_n=None):
    """x: (B, S, D).  w_folded: (D, D) bf16 in (in, out) layout.  b_folded: (1, D) f32.

    Returns (B, S, D) in x.dtype.  For bf16 end-to-end models pass x in bf16
    (LN stats stay f32 in-kernel); this halves streaming HBM traffic.
    """
    B, S, D = x.shape
    M = B * S
    x2 = x.reshape(M, D)

    vmem_cap = _vmem_capacity_bytes()
    vmem_cap_usable = int(vmem_cap * 0.85)       # headroom for compiler scratch
    big_vmem = vmem_cap >= (96 << 20)            # v5e/v6e (128 MiB) vs v7x (64 MiB)

    # Row tile: big tiles amortize the ~0.35us/step grid overhead and fill the
    # MXU M dimension.  Multiple of 16 (bf16 sublane packing); clamped for tiny
    # inputs.  No padding: the ragged last block is masked by Pallas.
    if tile_m is None:
        tile_m = 512 if (big_vmem and D <= 2048) else 256
    tile_m = max(16, min(tile_m, _round_up(M, 16)))

    # Output-column tile: keep the whole (D, D) bf16 weight resident for
    # moderate D; for large D use (D, tile_n) panels (v7x 64 MiB VMEM).
    if tile_n is None:
        tile_n = 512 if (D >= 2048 and D % 512 == 0) else D

    m_grid = pl.cdiv(M, tile_m)
    n_grid = pl.cdiv(D, tile_n)
    w_const = n_grid == 1          # weight/bias blocks grid-invariant -> single-buffer

    x_bytes = x.dtype.itemsize
    w_bufs = 1 if w_const else 2
    vmem_need = (
        2 * tile_m * D * x_bytes           # double-buffered x row tiles
        + 2 * tile_m * tile_n * x_bytes    # double-buffered out tiles
        + w_bufs * D * tile_n * 2          # bf16 weight panel(s)
        + w_bufs * tile_n * 4              # folded bias
        + tile_m * D * 2                   # bf16 xhat scratch
        + 3 * tile_m * D * 4               # f32 LN intermediates
    )
    vmem_limit = min(int(vmem_need * 1.25) + (2 << 20), vmem_cap_usable)

    cost = pl.CostEstimate(
        flops=2 * M * D * D,
        transcendentals=M,                 # one rsqrt per row
        bytes_accessed=M * D * 2 * x_bytes + D * D * 2 + D * 4,
    )

    out = pl.pallas_call(
        prenorm_linear_kernel,
        out_shape=jax.ShapeDtypeStruct((M, D), x.dtype),
        grid_spec=pltpu.PrefetchScalarGridSpec(
            num_scalar_prefetch=0,
            grid=(m_grid, n_grid),
            in_specs=[
                pl.BlockSpec((tile_m, D), lambda i, j: (i, 0)),             # x rows
                _maybe_single_buffered_spec((D, tile_n), lambda i, j: (0, j), w_const),
                _maybe_single_buffered_spec((1, tile_n), lambda i, j: (0, j), w_const),
            ],
            out_specs=pl.BlockSpec((tile_m, tile_n), lambda i, j: (i, j)),
            scratch_shapes=[pltpu.VMEM((tile_m, D), jnp.bfloat16)],          # cached xhat
        ),
        compiler_params=pltpu.CompilerParams(
            dimension_semantics=("parallel", "arbitrary"),
            vmem_limit_bytes=vmem_limit,
        ),
        cost_estimate=cost,
    )(x2, w_folded, b_folded)

    return out.reshape(B, S, D)


def _reference(x, gamma, beta, w, wb):
    xf = x.astype(jnp.float32)
    mean = jnp.mean(xf, axis=-1, keepdims=True)
    var = jnp.mean((xf - mean) ** 2, axis=-1, keepdims=True)
    xhat = (xf - mean) / jnp.sqrt(var + LN_EPS)
    y = xhat * gamma + beta
    return (y @ w + wb).astype(x.dtype)


if __name__ == "__main__":
    key = jax.random.PRNGKey(0)
    B, S, D = 2, 8, 32
    k_x, k_g, k_b, k_w, k_wb = jax.random.split(key, 5)

    x = jax.random.normal(k_x, (B, S, D), dtype=jnp.float32)
    # Deterministic synthetic parameters (nn.LayerNorm(dim) + nn.Linear(dim, dim)).
    gamma = 1.0 + 0.1 * jax.random.normal(k_g, (D,), dtype=jnp.float32)
    beta = 0.1 * jax.random.normal(k_b, (D,), dtype=jnp.float32)
    # PyTorch Linear stores W as (out, in); the kernel consumes W.T as (in, out).
    w_torch_layout = 0.1 * jax.random.normal(k_w, (D, D), dtype=jnp.float32)
    w = w_torch_layout.T
    wb = 0.1 * jax.random.normal(k_wb, (D,), dtype=jnp.float32)

    # One-time parameter prep (hoisted out of the per-call path, per review).
    w_folded, b_folded = fold_layernorm_into_linear(gamma, beta, w, wb)

    out = prenorm_linear(x, w_folded, b_folded)
    out = jax.block_until_ready(out)

    ref = _reference(x, gamma, beta, w, wb)
    assert out.shape == (B, S, D)
    # Matmul runs in bf16 (f32 accumulate) -> loosened tolerance vs pure-f32 ref.
    assert jnp.allclose(out, ref, atol=5e-2, rtol=5e-2), "mismatch vs reference"

    print("KERNEL_OK")
</pallas_src>

<mosaic_0001>
module attributes {stable_mosaic.version = 11 : i64} {
  func.func @prenorm_linear_kernel(%arg0: i32, %arg1: i32, %arg2: memref<16x32xf32, #tpu.memory_space<vmem>>, %arg3: memref<32x32xbf16, #tpu.memory_space<vmem>>, %arg4: memref<1x32xf32, #tpu.memory_space<vmem>>, %arg5: memref<16x32xf32, #tpu.memory_space<vmem>>, %arg6: memref<16x32xbf16, #tpu.memory_space<vmem>>) attributes {dimension_semantics = [#tpu.dimension_semantics<parallel>, #tpu.dimension_semantics<arbitrary>], iteration_bounds = array<i64: 1, 1>, scalar_prefetch = 0 : i64, scratch_operands = 1 : i64, tpu.core_type = #tpu.core_type<tc>, window_params = [{transform_indices = @transform_0, window_bounds = array<i64: 16, 32>}, {pipeline_mode = #tpu.pipeline_mode<synchronous>, transform_indices = @transform_1, window_bounds = array<i64: 32, 32>}, {pipeline_mode = #tpu.pipeline_mode<synchronous>, transform_indices = @transform_2, window_bounds = array<i64: 1, 32>}, {transform_indices = @transform_3, window_bounds = array<i64: 16, 32>}]} {
    %c0_i32 = arith.constant 0 : i32
    %0 = arith.cmpi eq, %arg1, %c0_i32 : i32
    %1 = arith.extui %0 : i1 to i32
    %c0_i32_0 = arith.constant 0 : i32
    %2 = arith.cmpi ne, %1, %c0_i32_0 : i32
    scf.if %2 {
      %c0_8 = arith.constant 0 : index
      %c0_9 = arith.constant 0 : index
      %10 = vector.load %arg2[%c0_8, %c0_9] : memref<16x32xf32, #tpu.memory_space<vmem>>, vector<16x32xf32>
      %cst_10 = arith.constant dense<0.000000e+00> : vector<16xf32>
      %11 = vector.multi_reduction <add>, %10, %cst_10 [1] : vector<16x32xf32> to vector<16xf32>
      %12 = vector.shape_cast %11 : vector<16xf32> to vector<16x1xf32>
      %cst_11 = arith.constant 3.200000e+01 : f32
      %13 = vector.broadcast %cst_11 : f32 to vector<16x1xf32>
      %14 = arith.divf %12, %13 : vector<16x1xf32>
      %15 = arith.mulf %10, %10 : vector<16x32xf32>
      %cst_12 = arith.constant dense<0.000000e+00> : vector<16xf32>
      %16 = vector.multi_reduction <add>, %15, %cst_12 [1] : vector<16x32xf32> to vector<16xf32>
      %17 = vector.shape_cast %16 : vector<16xf32> to vector<16x1xf32>
      %cst_13 = arith.constant 3.200000e+01 : f32
      %18 = vector.broadcast %cst_13 : f32 to vector<16x1xf32>
      %19 = arith.divf %17, %18 : vector<16x1xf32>
      %20 = arith.mulf %14, %14 : vector<16x1xf32>
      %21 = arith.subf %19, %20 : vector<16x1xf32>
      %cst_14 = arith.constant 0.000000e+00 : f32
      %22 = vector.broadcast %cst_14 : f32 to vector<16x1xf32>
      %23 = arith.maximumf %21, %22 : vector<16x1xf32>
      %cst_15 = arith.constant 9.99999974E-6 : f32
      %24 = vector.broadcast %cst_15 : f32 to vector<16x1xf32>
      %25 = arith.addf %23, %24 : vector<16x1xf32>
      %26 = math.rsqrt %25 : vector<16x1xf32>
      %27 = vector.broadcast %14 : vector<16x1xf32> to vector<16x32xf32>
      %28 = arith.subf %10, %27 : vector<16x32xf32>
      %29 = vector.broadcast %26 : vector<16x1xf32> to vector<16x32xf32>
      %30 = arith.mulf %28, %29 : vector<16x32xf32>
      %31 = arith.truncf %30 : vector<16x32xf32> to vector<16x32xbf16>
      %c0_16 = arith.constant 0 : index
      %c0_17 = arith.constant 0 : index
      %32 = vector.load %arg6[%c0_16, %c0_17] : memref<16x32xbf16, #tpu.memory_space<vmem>>, vector<16x32xbf16>
      tpu.vector_store %arg6[%c0_16, %c0_17], %31 {strides = array<i32>} : memref<16x32xbf16, #tpu.memory_space<vmem>>, vector<16x32xbf16>,
    } else {
    }
    %c0 = arith.constant 0 : index
    %c0_1 = arith.constant 0 : index
    %3 = vector.load %arg6[%c0, %c0_1] : memref<16x32xbf16, #tpu.memory_space<vmem>>, vector<16x32xbf16>
    %c0_2 = arith.constant 0 : index
    %c0_3 = arith.constant 0 : index
    %4 = vector.load %arg3[%c0_2, %c0_3] : memref<32x32xbf16, #tpu.memory_space<vmem>>, vector<32x32xbf16>
    %cst = arith.constant dense<0.000000e+00> : vector<16x32xf32>
    %5 = tpu.matmul %3, %4, %cst {dimension_numbers = #tpu.dot_dimension_numbers<[1], [0], [0], [1], [0, 0, 1, 1], [], []>} : vector<16x32xbf16>, vector<32x32xbf16>, vector<16x32xf32> -> vector<16x32xf32>
    %c0_4 = arith.constant 0 : index
    %c0_5 = arith.constant 0 : index
    %6 = vector.load %arg4[%c0_4, %c0_5] : memref<1x32xf32, #tpu.memory_space<vmem>>, vector<1x32xf32>
    %7 = vector.broadcast %6 : vector<1x32xf32> to vector<16x32xf32>
    %8 = arith.addf %5, %7 : vector<16x32xf32>
    %c0_6 = arith.constant 0 : index
    %c0_7 = arith.constant 0 : index
    %9 = vector.load %arg5[%c0_6, %c0_7] : memref<16x32xf32, #tpu.memory_space<vmem>>, vector<16x32xf32>
    tpu.vector_store %arg5[%c0_6, %c0_7], %8 {strides = array<i32>} : memref<16x32xf32, #tpu.memory_space<vmem>>, vector<16x32xf32>,
    return
  }
  func.func @transform_0(%arg0: i32, %arg1: i32) -> (i32, i32) {
    %c0_i32 = arith.constant 0 : i32
    %c0_i32_0 = arith.constant 0 : i32
    return %arg0, %c0_i32 : i32, i32
  }
  func.func @transform_1(%arg0: i32, %arg1: i32) -> (i32, i32) {
    %c0_i32 = arith.constant 0 : i32
    %c0_i32_0 = arith.constant 0 : i32
    return %c0_i32, %arg1 : i32, i32
  }
  func.func @transform_2(%arg0: i32, %arg1: i32) -> (i32, i32) {
    %c0_i32 = arith.constant 0 : i32
    %c0_i32_0 = arith.constant 0 : i32
    return %c0_i32, %arg1 : i32, i32
  }
  func.func @transform_3(%arg0: i32, %arg1: i32) -> (i32, i32) {
    %c0_i32 = arith.constant 0 : i32
    return %arg0, %arg1 : i32, i32
  }
}

</mosaic_0001>

<bundles_post_ra>
// kernel: tpu_custom_call.1
= control target key start
LH: loop header
LB: loop body
LE: loop exit
PB: predicated region body
PF: predicated region fallthrough
CT: control target
= control target key end

     0   :  { %8 = vsyncpa [#allocation4], 0  ;;  %s352_s0 = inlined_call_operand.hbm [shape: f32[16,32], index: 0, kind: input, shape index: {}]   ;;  %s353_s1 = inlined_call_operand.hbm [shape: bf16[32,32], index: 1, kind: input, shape index: {}]   ;;  %s354_s2 = inlined_call_operand.vmem [shape: f32[1,32], index: 2, kind: input, shape index: {}]   ;;  %s355_s3 = inlined_call_operand.hbm [shape: f32[16,32], index: 3, kind: output, shape index: {}]  }
   0x1   :  { %9 = vsyncpa [#allocation7], 0 }
   0x2   :  { %10 = vsyncpa [#allocation5], 0  ;;  %s15_s14 = sshll.u32 %s352_s0, 4  ;;  %s293_s15 = smov [#allocation3]   ;;  %s16_s14 = int_to_ptr.hbm [resolvable:$true] %s15_s14 }
   0x3   :  { %s17_s16 = sshll.u32 %s293_s15, 4  ;;  %s28_s19 = sshll.u32 %s353_s1, 4  ;;  %s18_s16 = int_to_ptr.vmem [resolvable:$true] %s17_s16  ;;  %s29_s19 = int_to_ptr.hbm [resolvable:$true] %s28_s19 }
   0x4   :  { %s294_s20 = smov 128   ;;  %s295_s21 = smov 8  }
   0x5   :  { %23 = dma.hbm_to_vmem [thread:$0]  %s16_s14, 256, %s18_s16, [#allocation4], %s294_s20, %s294_s20, %s295_s21  }
   0x6   :  { %s296_s22 = smov [#allocation6]   ;;  %s297_s24 = smov 64  }
   0x7   :  { %s30_s23 = sshll.u32 %s296_s22, 4  ;;  %s298_s0 = smov 4   ;;  %s31_s23 = int_to_ptr.vmem [resolvable:$true] %s30_s23 }
   0x8   :  { %36 = dma.hbm_to_vmem [thread:$0]  %s29_s19, 256, %s31_s23, [#allocation7], %s297_s24, %s297_s24, %s298_s0  }
   0x9   :  { %287 = dma.done.wait [#allocation4], 256  }
   0xa   :  { %288 = vsyncadd [#allocation4], 4294967040 }
   0xb   :  { %289 = dma.done.wait [#allocation7], 256  }
   0xc   :  { %290 = vsyncadd [#allocation7], 4294967040  ;;  %vm54_vm0 = vcmask 261120   ;;  %v52_v0 = vld [vmem:[#allocation3] sm:$0xff]  ;;  %v331_v3 = vld [vmem:[#allocation3 + $0x8] sm:$0xff]  ;;  %v299_v8 = vmov 32.0  }
   0xd   :  { %v55_v1 = vsel %vm54_vm0, %v52_v0, 0.0  ;;  %v70_v2 = vmul.f32 %v52_v0, %v52_v0  ;;  %v71_v5 = vmul.f32 %v331_v3, %v331_v3  ;;  %v58_v6 = vsel %vm54_vm0, %v331_v3, 0.0  ;;  %v199_v26 = vld [vmem:[#allocation6 + $0x8] sm:$0xff]  ;;  %v198_v29 = vld [vmem:[#allocation6] sm:$0xff]  ;;  %s300_s26 = smov [#allocation8]   ;;  %s170_s30 = sshll.u32 %s355_s3, 4  ;;  %s171_s30 = int_to_ptr.hbm [resolvable:$true] %s170_s30 }
   0xe   :  { %56 = vadd.xlane.f32.xlu0 %v55_v1  ;;  %209 = vrcp.f32 %v299_v8  ;;  %154 = vmatpush.bf16.msra.mxu0 %v199_v26  ;;  %vm114_vm5 = vcmask 257024   ;;  %v208_v54 = vld [vmem:[%s354_s2] ss:$0 sm:$0xff]  ;;  %s168_s27 = sshll.u32 %s300_s26, 4  ;;  %s169_s27 = int_to_ptr.vmem [resolvable:$true] %s168_s27 }
   0xf   :  { %v72_v4 = vsel %vm54_vm0, %v70_v2, 0.0  ;;  %v75_v7 = vsel %vm54_vm0, %v71_v5, 0.0 }
  0x10   :  { %73 = vadd.xlane.f32.xlu1 %v72_v4 }
  0x12   :  { %155 = vmatpush.bf16.msra.mxu0 %v198_v29 }
  0x14   :  { %v210_v9 = vpop.eup %209 }
  0x15   :  { %v62_v10 = vmul.f32 32.0, %v210_v9  ;;  %vm66_vm1 = vweird.f32 %v210_v9 }
  0x16   :  { %59 = vadd.xlane.f32.xlu0 %v58_v6 }
  0x17   :  { %v63_v11 = vsub.f32 1.0, %v62_v10 }
  0x18   :  { %76 = vadd.xlane.f32.xlu1 %v75_v7 }
  0x19   :  { %v64_v12 = vmul.f32 %v210_v9, %v63_v11 }
  0x1b   :  { %v65_v13 = vadd.f32 %v210_v9, %v64_v12 }
  0x1d   :  { %v67_v14 = vsel %vm66_vm1, %v210_v9, %v65_v13 }
  0x81   :  { %v57_v15 = vpop.xlane.xlu0 %56 }
  0x82   :  { %v68_v16 = vmul.f32 %v67_v14, %v57_v15 }
  0x83   :  { %v74_v17 = vpop.xlane.xlu1 %73 }
  0x84   :  { %v80_v18 = vmul.f32 %v68_v16, %v68_v16  ;;  %v78_v19 = vmul.f32 %v74_v17, %v67_v14  ;;  %v108_v40 = vsub.f32 %v52_v0, %v68_v16 }
  0x86   :  { %v82_v20 = vsub.f32 %v78_v19, %v80_v18 }
  0x88   :  { %v84_v21 = vmax.f32 %v82_v20, 0.0 }
  0x89   :  { %v60_v22 = vpop.xlane.xlu0 %59 }
  0x8a   :  { %v86_v23 = vadd.f32 1e-05, %v84_v21  ;;  %v69_v24 = vmul.f32 %v67_v14, %v60_v22 }
  0x8b   :  { %v77_v25 = vpop.xlane.xlu1 %76 }
  0x8c   :  { %211 = vrsqrt.f32 %v86_v23  ;;  %v81_v27 = vmul.f32 %v69_v24, %v69_v24  ;;  %v79_v28 = vmul.f32 %v77_v25, %v67_v14  ;;  %vm94_vm3 = vweird.f32 %v86_v23 }
  0x8d   :  { %v109_v49 = vsub.f32 %v331_v3, %v69_v24 }
  0x8e   :  { %v83_v30 = vsub.f32 %v79_v28, %v81_v27 }
  0x90   :  { %v85_v31 = vmax.f32 %v83_v30, 0.0 }
  0x92   :  { %v212_v32 = vpop.eup %211  ;;  %v87_v34 = vadd.f32 1e-05, %v85_v31 }
  0x93   :  { %v89_v33 = vmul.f32 %v212_v32, %v86_v23  ;;  %vm95_vm2 = vweird.f32 %v212_v32 }
  0x94   :  { %213 = vrsqrt.f32 %v87_v34  ;;  %vm96_vm4 = vmor %vm94_vm3, %vm95_vm2  ;;  %vm104_vm7 = vweird.f32 %v87_v34 }
  0x95   :  { %v90_v35 = vmul.f32 %v212_v32, %v89_v33 }
  0x97   :  { %v91_v36 = vmul.f32 0.5, %v90_v35 }
  0x99   :  { %v92_v37 = vsub.f32 1.5, %v91_v36 }
  0x9a   :  { %v214_v38 = vpop.eup %213 }
  0x9b   :  { %v93_v39 = vmul.f32 %v212_v32, %v92_v37  ;;  %v99_v41 = vmul.f32 %v214_v38, %v87_v34  ;;  %vm105_vm6 = vweird.f32 %v214_v38 }
  0x9c   :  { %vm106_vm8 = vmor %vm104_vm7, %vm105_vm6 }
  0x9d   :  { %v97_v42 = vsel %vm96_vm4, %v212_v32, %v93_v39  ;;  %v100_v44 = vmul.f32 %v214_v38, %v99_v41 }
  0x9e   :  { %v110_v43 = vmul.f32 %v108_v40, %v97_v42 }
  0x9f   :  { %v101_v46 = vmul.f32 0.5, %v100_v44 }
  0xa0   :  { %v112_v45 = vpack.c.bf16 %v110_v43, %v110_v43 }
  0xa1   :  { %v102_v47 = vsub.f32 1.5, %v101_v46 }
  0xa2   :  { %115 = vst.msk [vmem:[#allocation2] sm:$0xf] %vm114_vm5, %v112_v45 }
  0xa3   :  { %v103_v48 = vmul.f32 %v214_v38, %v102_v47 }
  0xa5   :  { %v107_v50 = vsel %vm106_vm8, %v214_v38, %v103_v48 }
  0xa6   :  { %v111_v51 = vmul.f32 %v109_v49, %v107_v50 }
  0xa8   :  { %v113_v52 = vpack.c.bf16 %v111_v51, %v111_v51 }
  0xaa   :  { %116 = vst.msk [vmem:[#allocation2 + $0x4] sm:$0xf] %vm114_vm5, %v113_v52 }
  0xb1   :  { %v197_v53 = vld [vmem:[#allocation2] sm:$0xff] }
  0xb2   :  { %196 = vmatmul.msk.bf16.vlgmr.msra.gmra.mxu0 %vm54_vm0, %v197_v53 }
 0x12f   :  { %v157_v55 = vpop.f32.mrf.mxu0 }
 0x130   :  { %v158_v56 = vadd.f32 %v208_v54, %v157_v55 }
 0x132   :  { %162 = vst.msk [vmem:[#allocation8] sm:$0xff] %vm54_vm0, %v158_v56 }
 0x137   :  { %v159_v57 = vpop.f32.mrf.mxu0 }
 0x138   :  { %v160_v58 = vadd.f32 %v208_v54, %v159_v57 }
 0x13a   :  { %163 = vst.msk [vmem:[#allocation8 + $0x8] sm:$0xff] %vm54_vm0, %v160_v58 }
 0x13b   :  { %176 = dma.vmem_to_hbm [thread:$0]  %s169_s27, 256, %s171_s30, [#allocation5], %s294_s20, %s294_s20, %s295_s21  }
 0x13c   :  { %291 = dma.done.wait [#allocation5], 256  }
 0x13d   :  { %292 = vsyncadd [#allocation5], 4294967040 }
 0x13e   :  { %181 = vsyncpa [#allocation4], 1 }
 0x13f   :  { %182 = vsyncpa [#allocation7], 1 }
 0x140   :  { %183 = vsyncpa [#allocation5], 1 }

</bundles_post_ra>
